<compile_context>
chip_gen: v7x
topology: tpu7x:2x2x1
jax: 0.10.0
libtpu: 0.0.40
codegen_flags: <defaults>
</compile_context>

<pallas_src>
import jax
import jax.numpy as jnp
from jax.experimental import pallas as pl
from jax.experimental.pallas import tpu as pltpu

EPS = 1e-5  # nn.LayerNorm default


def addnorm_kernel(x_ref, y_ref, gamma_ref, beta_ref, o_ref):
    # Dropout is identity in eval mode (inference semantics).
    # TODO(synk): training-mode dropout would need pltpu.prng_seed per grid
    # step (or pltpu.sample_block) to avoid identical masks across tiles.
    z = y_ref[...].astype(jnp.float32) + x_ref[...].astype(jnp.float32)
    # Two-pass (centered) mean/var kept for numerical robustness; at these
    # tile sizes the VPU/XLU work is hidden under the HBM DMA anyway.
    mean = jnp.mean(z, axis=-1, keepdims=True)
    centered = z - mean
    var = jnp.mean(centered * centered, axis=-1, keepdims=True)
    inv = jax.lax.rsqrt(var + EPS)
    out = centered * inv * gamma_ref[...] + beta_ref[...]  # gamma/beta already f32
    o_ref[...] = out.astype(o_ref.dtype)


def _sublane_multiple(dtype):
    itemsize = jnp.dtype(dtype).itemsize
    if itemsize >= 4:
        return 8
    if itemsize == 2:
        return 16
    return 32


def _choose_row_tile(rows, hidden, itemsize, sublane,
                     vmem_tile_budget_bytes=32 << 20, max_row_tile=1024):
    """Pick the largest sublane-aligned row tile that fits the VMEM budget."""
    # Per-row live VMEM per grid step:
    #   (2 inputs + 1 output) x 2 double-buffers x hidden x itemsize
    #   + ~2 f32 intermediate slabs of headroom for the compiler's temporaries.
    bytes_per_row = 6 * hidden * itemsize + 8 * hidden
    tile = max(sublane, vmem_tile_budget_bytes // max(bytes_per_row, 1))
    tile = min(tile, max_row_tile)
    tile = max(sublane, (tile // sublane) * sublane)

    # Don't exceed the (sublane-padded) problem size.
    rows_up = ((rows + sublane - 1) // sublane) * sublane
    tile = min(tile, rows_up)

    # Prefer >= 2 grid steps so v7x's two TensorCores both get a share.
    if rows_up > sublane and pl.cdiv(rows_up, tile) < 2:
        tile = max(sublane, ((tile // 2) // sublane) * sublane)
    return tile


def add_norm(x, y, gamma, beta):
    assert x.shape == y.shape, "X and Y must have the same shape"
    orig_shape = x.shape
    hidden = orig_shape[-1]
    rows = 1
    for d in orig_shape[:-1]:
        rows *= d

    out_dtype = x.dtype
    itemsize = jnp.dtype(out_dtype).itemsize
    sublane = _sublane_multiple(out_dtype)
    row_tile = _choose_row_tile(rows, hidden, itemsize, sublane)

    x2 = x.reshape(rows, hidden)
    y2 = y.reshape(rows, hidden)
    # Pre-cast params to f32 once here; constant index_map keeps them
    # VMEM-resident so they are DMA'd a single time.
    g2 = gamma.reshape(1, hidden).astype(jnp.float32)
    b2 = beta.reshape(1, hidden).astype(jnp.float32)

    # Pad rows up to a multiple of row_tile so every block (and store) is
    # full-size and sublane/lane-dense; padded rows are sliced off afterwards.
    num_tiles = pl.cdiv(rows, row_tile)
    rows_padded = num_tiles * row_tile
    if rows_padded != rows:
        pad = rows_padded - rows
        x2 = jnp.pad(x2, ((0, pad), (0, 0)))
        y2 = jnp.pad(y2, ((0, pad), (0, 0)))

    out = pl.pallas_call(
        addnorm_kernel,
        out_shape=jax.ShapeDtypeStruct((rows_padded, hidden), out_dtype),
        grid_spec=pltpu.PrefetchScalarGridSpec(
            num_scalar_prefetch=0,
            grid=(num_tiles,),
            in_specs=[
                pl.BlockSpec((row_tile, hidden), lambda i: (i, 0)),
                pl.BlockSpec((row_tile, hidden), lambda i: (i, 0)),
                pl.BlockSpec((1, hidden), lambda i: (0, 0)),
                pl.BlockSpec((1, hidden), lambda i: (0, 0)),
            ],
            out_specs=pl.BlockSpec((row_tile, hidden), lambda i: (i, 0)),
        ),
        compiler_params=pltpu.CompilerParams(
            dimension_semantics=("parallel",),
            # Raise the scoped-VMEM cap (v5e default 16 MiB, v6e/v7x 32 MiB)
            # while staying well under v7x's 64 MiB physical VMEM.
            vmem_limit_bytes=48 << 20,
        ),
    )(x2, y2, g2, b2)

    if rows_padded != rows:
        out = out[:rows]
    return out.reshape(orig_shape)


def _ref_addnorm(x, y, gamma, beta):
    z = x + y  # eval-mode dropout == identity
    mean = jnp.mean(z, axis=-1, keepdims=True)
    var = jnp.mean((z - mean) ** 2, axis=-1, keepdims=True)
    return (z - mean) / jnp.sqrt(var + EPS) * gamma + beta


if __name__ == "__main__":
    key = jax.random.PRNGKey(0)
    kx, ky = jax.random.split(key)

    batch, seq, hidden = 2, 8, 32
    x = jax.random.normal(kx, (batch, seq, hidden), dtype=jnp.float32)
    y = jax.random.normal(ky, (batch, seq, hidden), dtype=jnp.float32)

    # Deterministic LayerNorm params (PyTorch default init: weight=1, bias=0).
    gamma = jnp.ones((hidden,), dtype=jnp.float32)
    beta = jnp.zeros((hidden,), dtype=jnp.float32)

    out = add_norm(x, y, gamma, beta)
    jax.block_until_ready(out)
    ref = _ref_addnorm(x, y, gamma, beta)
    assert jnp.allclose(out, ref, atol=1e-5, rtol=1e-5), "mismatch vs reference"

    # Ragged case: rows = 3*5 = 15 is not a tile multiple -> exercises padding.
    x_r = jax.random.normal(kx, (3, 5, hidden), dtype=jnp.float32)
    y_r = jax.random.normal(ky, (3, 5, hidden), dtype=jnp.float32)
    out_r = add_norm(x_r, y_r, gamma, beta)
    jax.block_until_ready(out_r)
    ref_r = _ref_addnorm(x_r, y_r, gamma, beta)
    assert jnp.allclose(out_r, ref_r, atol=1e-5, rtol=1e-5), "ragged mismatch"

    print("KERNEL_OK")
</pallas_src>

<mosaic_0001>
module attributes {stable_mosaic.version = 11 : i64} {
  func.func @addnorm_kernel(%arg0: i32, %arg1: memref<8x32xf32, #tpu.memory_space<vmem>>, %arg2: memref<8x32xf32, #tpu.memory_space<vmem>>, %arg3: memref<1x32xf32, #tpu.memory_space<vmem>>, %arg4: memref<1x32xf32, #tpu.memory_space<vmem>>, %arg5: memref<8x32xf32, #tpu.memory_space<vmem>>) attributes {dimension_semantics = [#tpu.dimension_semantics<parallel>], iteration_bounds = array<i64: 2>, scalar_prefetch = 0 : i64, scratch_operands = 0 : i64, tpu.core_type = #tpu.core_type<tc>, window_params = [{transform_indices = @transform_0, window_bounds = array<i64: 8, 32>}, {transform_indices = @transform_1, window_bounds = array<i64: 8, 32>}, {pipeline_mode = #tpu.pipeline_mode<synchronous>, transform_indices = @transform_2, window_bounds = array<i64: 1, 32>}, {pipeline_mode = #tpu.pipeline_mode<synchronous>, transform_indices = @transform_3, window_bounds = array<i64: 1, 32>}, {transform_indices = @transform_4, window_bounds = array<i64: 8, 32>}]} {
    %c0 = arith.constant 0 : index
    %c0_0 = arith.constant 0 : index
    %0 = vector.load %arg2[%c0, %c0_0] : memref<8x32xf32, #tpu.memory_space<vmem>>, vector<8x32xf32>
    %c0_1 = arith.constant 0 : index
    %c0_2 = arith.constant 0 : index
    %1 = vector.load %arg1[%c0_1, %c0_2] : memref<8x32xf32, #tpu.memory_space<vmem>>, vector<8x32xf32>
    %2 = arith.addf %0, %1 : vector<8x32xf32>
    %cst = arith.constant dense<0.000000e+00> : vector<8xf32>
    %3 = vector.multi_reduction <add>, %2, %cst [1] : vector<8x32xf32> to vector<8xf32>
    %4 = vector.shape_cast %3 : vector<8xf32> to vector<8x1xf32>
    %cst_3 = arith.constant 3.200000e+01 : f32
    %5 = vector.broadcast %cst_3 : f32 to vector<8x1xf32>
    %6 = arith.divf %4, %5 : vector<8x1xf32>
    %7 = vector.broadcast %6 : vector<8x1xf32> to vector<8x32xf32>
    %8 = arith.subf %2, %7 : vector<8x32xf32>
    %9 = arith.mulf %8, %8 : vector<8x32xf32>
    %cst_4 = arith.constant dense<0.000000e+00> : vector<8xf32>
    %10 = vector.multi_reduction <add>, %9, %cst_4 [1] : vector<8x32xf32> to vector<8xf32>
    %11 = vector.shape_cast %10 : vector<8xf32> to vector<8x1xf32>
    %cst_5 = arith.constant 3.200000e+01 : f32
    %12 = vector.broadcast %cst_5 : f32 to vector<8x1xf32>
    %13 = arith.divf %11, %12 : vector<8x1xf32>
    %cst_6 = arith.constant 9.99999974E-6 : f32
    %14 = vector.broadcast %cst_6 : f32 to vector<8x1xf32>
    %15 = arith.addf %13, %14 : vector<8x1xf32>
    %16 = math.rsqrt %15 : vector<8x1xf32>
    %17 = vector.broadcast %16 : vector<8x1xf32> to vector<8x32xf32>
    %18 = arith.mulf %8, %17 : vector<8x32xf32>
    %c0_7 = arith.constant 0 : index
    %c0_8 = arith.constant 0 : index
    %19 = vector.load %arg3[%c0_7, %c0_8] : memref<1x32xf32, #tpu.memory_space<vmem>>, vector<1x32xf32>
    %20 = vector.broadcast %19 : vector<1x32xf32> to vector<8x32xf32>
    %21 = arith.mulf %18, %20 : vector<8x32xf32>
    %c0_9 = arith.constant 0 : index
    %c0_10 = arith.constant 0 : index
    %22 = vector.load %arg4[%c0_9, %c0_10] : memref<1x32xf32, #tpu.memory_space<vmem>>, vector<1x32xf32>
    %23 = vector.broadcast %22 : vector<1x32xf32> to vector<8x32xf32>
    %24 = arith.addf %21, %23 : vector<8x32xf32>
    %c0_11 = arith.constant 0 : index
    %c0_12 = arith.constant 0 : index
    %25 = vector.load %arg5[%c0_11, %c0_12] : memref<8x32xf32, #tpu.memory_space<vmem>>, vector<8x32xf32>
    tpu.vector_store %arg5[%c0_11, %c0_12], %24 {strides = array<i32>} : memref<8x32xf32, #tpu.memory_space<vmem>>, vector<8x32xf32>,
    return
  }
  func.func @transform_0(%arg0: i32) -> (i32, i32) {
    %c0_i32 = arith.constant 0 : i32
    %c0_i32_0 = arith.constant 0 : i32
    return %arg0, %c0_i32 : i32, i32
  }
  func.func @transform_1(%arg0: i32) -> (i32, i32) {
    %c0_i32 = arith.constant 0 : i32
    %c0_i32_0 = arith.constant 0 : i32
    return %arg0, %c0_i32 : i32, i32
  }
  func.func @transform_2(%arg0: i32) -> (i32, i32) {
    %c0_i32 = arith.constant 0 : i32
    %c0_i32_0 = arith.constant 0 : i32
    %c0_i32_1 = arith.constant 0 : i32
    return %c0_i32, %c0_i32_0 : i32, i32
  }
  func.func @transform_3(%arg0: i32) -> (i32, i32) {
    %c0_i32 = arith.constant 0 : i32
    %c0_i32_0 = arith.constant 0 : i32
    %c0_i32_1 = arith.constant 0 : i32
    return %c0_i32, %c0_i32_0 : i32, i32
  }
  func.func @transform_4(%arg0: i32) -> (i32, i32) {
    %c0_i32 = arith.constant 0 : i32
    %c0_i32_0 = arith.constant 0 : i32
    return %arg0, %c0_i32 : i32, i32
  }
}

</mosaic_0001>

<bundles_post_ra>
// kernel: tpu_custom_call.1
= control target key start
LH: loop header
LB: loop body
LE: loop exit
PB: predicated region body
PF: predicated region fallthrough
CT: control target
= control target key end

     0   :  { %9 = vsyncpa [#allocation3], 0  ;;  %s845_s0 = inlined_call_operand.hbm [shape: f32[16,32], index: 0, kind: input, shape index: {}]   ;;  %s846_s1 = inlined_call_operand.hbm [shape: f32[16,32], index: 1, kind: input, shape index: {}]   ;;  %s847_s2 = inlined_call_operand.vmem [shape: f32[1,32], index: 2, kind: input, shape index: {}]   ;;  %s848_s3 = inlined_call_operand.vmem [shape: f32[1,32], index: 3, kind: input, shape index: {}]   ;;  %s849_s4 = inlined_call_operand.hbm [shape: f32[16,32], index: 4, kind: output, shape index: {}]  }
   0x1   :  { %11 = vsyncpa [#allocation3 + $0x1], 0 }
   0x2   :  { %12 = vsyncpa [#allocation6], 0 }
   0x3   :  { %14 = vsyncpa [#allocation6 + $0x1], 0 }
   0x4   :  { %15 = vsyncpa [#allocation4], 0 }
   0x5   :  { %17 = vsyncpa [#allocation4 + $0x1], 0  ;;  %s622_s15 = smov 0   ;;  %s624_s16 = smov 0  }
   0x6   :  { %s626_s17 = smov 0   ;;  %s628_s18 = smov 0  }
   0x7 LB: > { %s643_s19 = sadd.s32 4294967295, %s592_s18   ;;  %s392_s20 = sadd.s32 4294967294, %s592_s18   ;;  %s592_s18 = sphi %s628_s18, %s868_s18   ;;  %s588_s17 = sphi %s626_s17, %s867_s17   ;;  %s584_s16 = sphi %s624_s16, %s866_s16   ;;  %s580_s15 = sphi %s622_s15, %s865_s15  }
   0x8   : > { %s647_s21 = sadd.s32 1, %s592_s18   ;;  %s30_s22 = sadd.s32 1, %s588_s17 }
   0x9   : > { %s27_s23 = ssub.s32 %s592_s18, %s647_s21  ;;  %p37_p0 = scmp.ne.s32.totalorder %s588_s17, %s584_s16 }
   0xa   : > { %p28_p1 = scmp.eq.s32.totalorder %s27_s23, 0  ;;  %p38_p2 = scmp.eq.s32.totalorder %s592_s18, 0 }
   0xb   : > { %p43_p3 = scmp.ne.s32.totalorder %s584_s16, %s580_s15  ;;  %p44_p4 = scmp.eq.s32.totalorder %s643_s19, 0 }
   0xc   : > { %s659_s24 = scalar_select %p28_p1, %s588_s17, %s30_s22  }
   0xd   : > { %p661_p5 = por %p38_p2, %p37_p0  ;;  %p665_p6 = por %p44_p4, %p43_p3 }
   0xe   : > { %p135_p7 = scmp.eq.s32.totalorder %s643_s19, 1  ;;  %p141_p8 = scmp.eq.s32.totalorder %s392_s20, 1 }
   0xf   : > { %s853_s26 = scalar_select %p665_p6, 1, 0 }
  0x10   : > { %p426_p10 = scmp.lt.s32.totalorder %s592_s18, 2  ;;  %p672_p11 = por %p135_p7, %p37_p0 }
  0x11   : > { %p676_p12 = por %p141_p8, %p43_p3  ;;  %s681_s29 = sand.u32 1, %s588_s17  }
  0x12   : > { %s854_s27 = scalar_select %p672_p11, 1, 0 }
  0x13   : > { %s855_s28 = scalar_select %p676_p12, 1, 0 }
  0x14   : > { %s396_s30 = sshll.u32 %s592_s18, 7  ;;  %s395_s5 = sshll.u32 %s681_s29, 3 }
  0x15   : > { %s690_s8 = scalar_lea.hbm %s845_s0, %s396_s30  ;;  %s171_s9 = scalar_lea.vmem [#allocation2], %s395_s5 }
  0x16   : > { %s178_s10 = sshll.u32 %s171_s9, 4  ;;  %p696_p13 = pnand %p426_p10, %p661_p5  ;;  %s700_s10 = int_to_ptr.vmem [resolvable:$true] %s178_s10 }
  0x17   : > { %s168_s12 = scalar_lea.sflag [#allocation3], %s681_s29  ;;  %s462_s13 = scalar_lea.hbm %s690_s8, 128 }
  0x18   : > { %p463_p2 = scmp.ne.s32.totalorder %s690_s8, %s462_s13  ;;  %p464_p3 = pneg %p696_p13 }
  0x19   : > { %s467_s22 = scalar_lea.hbm %s845_s0, 256  ;;  %p468_p5 = scmp.lt.u32.totalorder %s690_s8, %s845_s0 }
  0x1a   : > { %p465_p4 = pnand %p464_p3, %p463_p2  ;;  %p469_p8 = scmp.lt.u32.totalorder %s467_s22, %s462_s13 }
  0x1b   : > { %p471_p9 = scmp.lt.u32.totalorder %s462_s13, %s690_s8 }
  0x1c   : > { %p466_p7 = pneg %p465_p4  ;;  %p470_p10 = por %p469_p8, %p468_p5 }
  0x1e   : > { %p472_p0 = por %p471_p9, %p470_p10 }
  0x20   : > { %p473_p1 = pnand %p472_p0, %p466_p7 }
  0x22   : > { %476 = shalt.err (!%p473_p1)
}
  0x23   : > { %s477_s6 = scalar_lea.vmem %s700_s10, 128  ;;  %s594_s7 = smov [#allocation2]  }
  0x24   : > { %p478_p2 = scmp.ne.s32.totalorder %s700_s10, %s477_s6  ;;  %s482_s9 = sshll.u32 %s594_s7, 4  ;;  %s483_s9 = int_to_ptr.vmem [resolvable:$false] %s482_s9 }
  0x25   : > { %s484_s14 = scalar_lea.vmem %s483_s9, 256  ;;  %p485_p11 = scmp.lt.s32.totalorder %s700_s10, %s483_s9 }
  0x26   : > { %p480_p4 = pnand %p478_p2, %p464_p3  ;;  %p486_p5 = scmp.lt.s32.totalorder %s484_s14, %s477_s6 }
  0x28   : > { %p481_p12 = pneg %p480_p4  ;;  %p487_p8 = por %p486_p5, %p485_p11 }
  0x2a   : > { %p488_p9 = pnand %p487_p8, %p481_p12 }
  0x2c   : > { %491 = shalt.err (!%p488_p9)
}
  0x2d   : > { %418 = dma.hbm_to_vmem [thread:$0]  (!%p696_p13), %s690_s8, 128, %s700_s10, %s168_s12  }
  0x2e   : > { %p857_p0 = scmp.lt.s32.totalorder %s592_s18, 3  ;;  %p858_p1 = scmp.ge.s32.totalorder %s592_s18, 1 }
  0x2f   : > { %s743_s23 = scalar_lea.hbm %s846_s1, %s396_s30  ;;  %s189_s25 = scalar_lea.vmem [#allocation5], %s395_s5 }
  0x30   : > { %p734_p7 = pnand %p858_p1, %p857_p0  ;;  %s196_s6 = sshll.u32 %s189_s25, 4  ;;  %s197_s6 = int_to_ptr.vmem [resolvable:$true] %s196_s6 }
  0x31   : > { %s186_s8 = scalar_lea.sflag [#allocation6], %s681_s29  ;;  %s492_s10 = scalar_lea.hbm %s743_s23, 128 }
  0x32   : > { %s859_s13 = scalar_select %p734_p7, 1, 0 }
  0x33   : > { %p493_p11 = scmp.ne.s32.totalorder %s743_s23, %s492_s10  ;;  %s497_s30 = scalar_lea.hbm %s846_s1, 256 }
  0x34   : > { %p498_p2 = scmp.lt.u32.totalorder %s743_s23, %s846_s1  ;;  %p499_p4 = scmp.lt.u32.totalorder %s497_s30, %s492_s10 }
  0x35   : > { %p495_p12 = pnand %p493_p11, %p464_p3  ;;  %p501_p8 = scmp.lt.u32.totalorder %s492_s10, %s743_s23 }
  0x36   : > { %p500_p5 = por %p499_p4, %p498_p2 }
  0x37   : > { %p496_p10 = pneg %p495_p12 }
  0x38   : > { %p502_p9 = por %p501_p8, %p500_p5 }
  0x3a   : > { %p503_p0 = pnand %p502_p9, %p496_p10 }
  0x3c   : > { %506 = shalt.err (!%p503_p0)
}
  0x3d   : > { %s507_s29 = scalar_lea.vmem %s197_s6, 128  ;;  %s595_s5 = smov [#allocation5]  }
  0x3e   : > { %p508_p1 = scmp.ne.s32.totalorder %s197_s6, %s507_s29  ;;  %s512_s20 = sshll.u32 %s595_s5, 4  ;;  %s513_s20 = int_to_ptr.vmem [resolvable:$false] %s512_s20 }
  0x3f   : > { %s514_s22 = scalar_lea.vmem %s513_s20, 256  ;;  %p515_p6 = scmp.lt.s32.totalorder %s197_s6, %s513_s20 }
  0x40   : > { %p510_p11 = pnand %p508_p1, %p464_p3  ;;  %p516_p7 = scmp.lt.s32.totalorder %s514_s22, %s507_s29 }
  0x42   : > { %p511_p12 = pneg %p510_p11  ;;  %p517_p2 = por %p516_p7, %p515_p6 }
  0x44   : > { %p518_p4 = pnand %p517_p2, %p511_p12 }
  0x46   : > { %521 = shalt.err (!%p518_p4)
}
  0x47   : > { %421 = dma.hbm_to_vmem [thread:$0]  (!%p696_p13), %s743_s23, 128, %s197_s6, %s186_s8  }
  0x48   : > { %p860_p10 = scmp.ne.s32.totalorder %s859_s13, 0 }
  0x49   : > { %s770_s25 = sand.u32 (!%p860_p10), 1, %s584_s16   ;;  %p861_p6 = scmp.ne.s32.totalorder (!%p860_p10), %s853_s26, 0 }
  0x4a   : > { %205 = sbr.rel (%p860_p10) target bundleno = 414 (0x19e), region = 36  ;;  %s773_s10 = sshll.u32 (!%p860_p10), %s770_s25, 3 }
  0x4b   : > { %s208_s12 = scalar_lea.sflag (!%p860_p10), [#allocation3], %s770_s25  ;;  %s211_s7 = scalar_lea.vmem (!%p860_p10), [#allocation2], %s773_s10 }
  0x51   : > { %567 = dma.done.wait (%p861_p6), %s208_s12, 128  }
  0x52   : > { %569 = vsyncadd (%p861_p6), %s208_s12, 4294967168  ;;  %s217_s11 = scalar_lea.sflag [#allocation6], %s770_s25  ;;  %s220_s13 = scalar_lea.vmem [#allocation5], %s773_s10 }
  0x53   : > { %571 = dma.done.wait (%p861_p6), %s217_s11, 128  }
  0x54   : > { %573 = vsyncadd (%p861_p6), %s217_s11, 4294967168  ;;  %v250_v0 = vld [vmem:[%s220_s13] sm:$0xff]  ;;  %v251_v1 = vld [vmem:[%s211_s7] sm:$0xff]  ;;  %vm253_vm0 = vcmask 261120   ;;  %s406_s30 = sshll.u32 %s643_s19, 7  ;;  %s249_s9 = scalar_lea.vmem [#allocation7], %s773_s10 }
  0x55   : > { %v252_v2 = vadd.f32 %v251_v1, %v250_v0  ;;  %v403_v13 = vld [vmem:[%s847_s2] ss:$0 sm:$0xff]  ;;  %s299_s14 = sshll.u32 %s249_s9, 4  ;;  %s800_s20 = scalar_lea.hbm %s849_s4, %s406_s30  ;;  %s802_s14 = int_to_ptr.vmem [resolvable:$true] %s299_s14 }
  0x56   : > { %v404_v15 = vld [vmem:[%s848_s3] ss:$0 sm:$0xff]  ;;  %s286_s22 = scalar_lea.sflag [#allocation4], %s770_s25  ;;  %s522_s12 = scalar_lea.vmem %s802_s14, 128 }
  0x57   : > { %v254_v3 = vsel %vm253_vm0, %v252_v2, 0.0  ;;  %p523_p13 = scmp.ne.s32.totalorder %s802_s14, %s522_s12  ;;  %p862_p3 = scmp.ne.s32.totalorder %s854_s27, 0 }
  0x58   : > { %255 = vadd.xlane.f32.xlu0 %v254_v3  ;;  %s596_s19 = smov [#allocation7]  }
  0x59   : > { %p524_p7 = pnand %p523_p13, %p862_p3  ;;  %s526_s10 = sshll.u32 %s596_s19, 4  ;;  %s527_s10 = int_to_ptr.vmem [resolvable:$false] %s526_s10 }
  0x5a   : > { %s528_s7 = scalar_lea.vmem %s527_s10, 256  ;;  %p529_p8 = scmp.lt.s32.totalorder %s802_s14, %s527_s10 }
  0x5b   : > { %p525_p5 = pneg %p524_p7  ;;  %p530_p9 = scmp.lt.s32.totalorder %s528_s7, %s522_s12 }
  0x5d   : > { %p531_p0 = por %p530_p9, %p529_p8 }
  0x5f   : > { %p532_p1 = pnand %p531_p0, %p525_p5 }
  0xe5   : > { %v256_v4 = vpop.xlane.xlu0 %255 }
  0xe6   : > { %v258_v5 = vmul.f32 0.03125, %v256_v4 }
  0xe8   : > { %v259_v6 = vsub.f32 %v252_v2, %v258_v5 }
  0xea   : > { %v260_v7 = vmul.f32 %v259_v6, %v259_v6 }
  0xec   : > { %v261_v8 = vsel %vm253_vm0, %v260_v7, 0.0 }
  0xed   : > { %262 = vadd.xlane.f32.xlu0 %v261_v8 }
 0x17a   : > { %v263_v9 = vpop.xlane.xlu0 %262 }
 0x17b   : > { %v264_v10 = vmul.f32 0.03125, %v263_v9 }
 0x17d   : > { %v265_v11 = vadd.f32 1e-05, %v264_v10 }
 0x17f   : > { %460 = vrsqrt.f32 %v265_v11 }
 0x189   : > { %v461_v12 = vpop.eup %460 }
 0x18a   : > { %v267_v14 = vmul.f32 %v461_v12, %v259_v6 }
 0x18c   : > { %v275_v16 = vmul.f32 %v403_v13, %v267_v14 }
 0x18e   : > { %v283_v17 = vadd.f32 %v404_v15, %v275_v16 }
 0x190   : > { %284 = vst.msk [vmem:[%s249_s9] sm:$0xff] %vm253_vm0, %v283_v17 }
 0x191   : > { %535 = shalt.err (!%p532_p1)
}
 0x192   : > { %s536_s25 = scalar_lea.hbm %s800_s20, 128  ;;  %s540_s26 = scalar_lea.hbm %s849_s4, 256 }
 0x193   : > { %p537_p11 = scmp.ne.s32.totalorder %s800_s20, %s536_s25  ;;  %p541_p4 = scmp.lt.u32.totalorder %s800_s20, %s849_s4 }
 0x194   : > { %p542_p10 = scmp.lt.u32.totalorder %s540_s26, %s536_s25  ;;  %p544_p13 = scmp.lt.u32.totalorder %s536_s25, %s800_s20 }
 0x195   : > { %p538_p12 = pnand %p537_p11, %p862_p3 }
 0x196   : > { %p543_p6 = por %p542_p10, %p541_p4 }
 0x197   : > { %p539_p2 = pneg %p538_p12 }
 0x198   : > { %p545_p7 = por %p544_p13, %p543_p6 }
 0x19a   : > { %p546_p5 = pnand %p545_p7, %p539_p2 }
 0x19c   : > { %549 = shalt.err (!%p546_p5)
}
 0x19d   : > { %413 = dma.vmem_to_hbm [thread:$0]  (%p862_p3), %s802_s14, 128, %s800_s20, %s286_s22  }
 0x19e PF: > { %s311_s8 = sand.u32 1, %s580_s15   ;;  %p863_p8 = scmp.ne.s32.totalorder %s855_s28, 0 }
 0x19f   : > { %p864_p9 = scmp.ge.s32.totalorder %s592_s18, 2  ;;  %s312_s30 = scalar_lea.sflag [#allocation4], %s311_s8 }
 0x1a1   : > { %p423_p0 = pnand %p864_p9, %p863_p8 }
 0x1a3   : > { %575 = dma.done.wait (!%p423_p0), %s312_s30, 128  }
 0x1a4   : > { %577 = vsyncadd (!%p423_p0), %s312_s30, 4294967168  ;;  %p20_p1 = scmp.ge.s32.totalorder %s647_s21, 4   ;;  %s865_s15 = smov %s584_s16 }
 0x1a5   : > { %s866_s16 = smov %s588_s17  ;;  %s867_s17 = smov %s659_s24 }
 0x1a6   : > { %s868_s18 = smov %s647_s21  ;;  %22 = sbr.rel (!%p20_p1) target bundleno = 7 (0x7), region = 94 }
 0x1ad   :  { %317 = vsyncpa [#allocation3], 1 }
 0x1ae   :  { %319 = vsyncpa [#allocation3 + $0x1], 1 }
 0x1af   :  { %320 = vsyncpa [#allocation6], 1 }
 0x1b0   :  { %322 = vsyncpa [#allocation6 + $0x1], 1 }
 0x1b1   :  { %323 = vsyncpa [#allocation4], 1 }
 0x1b2   :  { %325 = vsyncpa [#allocation4 + $0x1], 1 }

</bundles_post_ra>
